<compile_context>
chip_gen: v7x
topology: tpu7x:2x2x1
jax: 0.10.0
libtpu: 0.0.40
codegen_flags: <defaults>
</compile_context>

<pallas_src>
import jax
import jax.numpy as jnp
from jax.experimental import pallas as pl
from jax.experimental.pallas import tpu as pltpu

_LANE = 128
_MASK = 0xFFF80000  # sign(1) + exponent(8) + top-4 mantissa bits of float32


def _bf16cut_kernel(x_ref, o_ref):
    x = x_ref[...].astype(jnp.float32)
    bits = pltpu.bitcast(x, jnp.uint32)
    masked = pltpu.bitcast(bits & jnp.uint32(_MASK), jnp.float32)
    # Preserve NaN exactly (a bare mask could turn some NaN payloads into Inf).
    # Note: torch's formula maps Inf -> NaN (inf/inf); we keep Inf instead,
    # which is irrelevant for the finite gradients this op is applied to.
    o_ref[...] = jnp.where(jnp.isfinite(x), masked, x)


def bf16cutfp(x: jax.Array, *, block_rows: int = 2048) -> jax.Array:
    """Elementwise 4-bit-mantissa truncation (torch float2bf16) via Pallas."""
    orig_shape = x.shape
    n = x.size
    if n == 0:
        return jnp.zeros(orig_shape, jnp.float32)

    xf = x.reshape(-1)

    # Pad only up to the next (8, 128) tile boundary (<= 1023 extra elements),
    # NOT up to a multiple of block_rows: keeps XLA-side pad/slice traffic
    # negligible (and zero for aligned sizes) and independent of tile size.
    rows = pl.cdiv(n, _LANE)
    rows = pl.cdiv(rows, 8) * 8
    total = rows * _LANE
    padded = total != n
    if padded:
        xf = jnp.pad(xf, (0, total - n))
    x2d = xf.reshape(rows, _LANE)

    # Large lane-dense tiles to amortize the ~0.35 us per-grid-step overhead.
    if rows <= block_rows:
        blk = rows                       # full extent: always a legal block
        grid = (1,)
    else:
        blk = max(8, (block_rows // 8) * 8)
        grid = (pl.cdiv(rows, blk),)     # partial last block handled by Pallas

    in_bytes = blk * _LANE * x2d.dtype.itemsize
    out_bytes = blk * _LANE * 4
    vmem_bytes = min(max(2 * (in_bytes + out_bytes) + (2 << 20), 16 << 20), 60 << 20)

    out2d = pl.pallas_call(
        _bf16cut_kernel,
        out_shape=jax.ShapeDtypeStruct((rows, _LANE), jnp.float32),
        grid_spec=pltpu.PrefetchScalarGridSpec(
            num_scalar_prefetch=0,
            grid=grid,
            in_specs=[pl.BlockSpec((blk, _LANE), lambda i: (i, 0))],
            out_specs=pl.BlockSpec((blk, _LANE), lambda i: (i, 0)),
        ),
        compiler_params=pltpu.CompilerParams(
            dimension_semantics=("parallel",),   # shards the grid across v7x's 2 TCs
            vmem_limit_bytes=vmem_bytes,
        ),
    )(x2d)

    if padded:
        return out2d.reshape(-1)[:n].reshape(orig_shape)
    return out2d.reshape(orig_shape)


def _reference(x):
    # Exact pure-JAX reimplementation of torch float2bf16 for normal inputs
    # and zero: integer exponent extraction instead of approximate log2, so
    # every arithmetic step below is exact in float32.
    x = x.astype(jnp.float32)
    a = jnp.abs(x)
    bits = jax.lax.bitcast_convert_type(a, jnp.uint32)
    e_biased = (bits >> 23).astype(jnp.uint32)                 # floor(log2(a)) + 127
    e_biased = jnp.where(a == 0.0, jnp.uint32(127), e_biased)  # a == 0 -> p = 1
    p = jax.lax.bitcast_convert_type(e_biased << 23, jnp.float32)
    return jnp.floor(a / p * 16.0) / 16.0 * p * jnp.sign(x)


if __name__ == "__main__":
    key = jax.random.PRNGKey(0)
    # NCHW input, as in the SSD gradient-quantization path.
    x = jax.random.normal(key, (2, 4, 16, 16), dtype=jnp.float32)
    x = x.at[0, 0, 0, :4].set(0.0)   # exercise the a == 0 branch

    y = bf16cutfp(x)
    jax.block_until_ready(y)
    assert y.shape == x.shape and y.dtype == jnp.float32
    assert jnp.array_equal(y, _reference(x)), "mismatch vs reference (aligned case)"

    # Ragged element count: exercises the small (8,128)-tile pad path.
    x2 = jax.random.normal(jax.random.PRNGKey(1), (3, 5, 7, 11), dtype=jnp.float32)
    y2 = bf16cutfp(x2)
    jax.block_until_ready(y2)
    assert jnp.array_equal(y2, _reference(x2)), "mismatch vs reference (ragged case)"

    print("KERNEL_OK")
</pallas_src>

<mosaic_0001>
module attributes {stable_mosaic.version = 11 : i64} {
  func.func @_bf16cut_kernel(%arg0: i32, %arg1: memref<16x128xf32, #tpu.memory_space<vmem>>, %arg2: memref<16x128xf32, #tpu.memory_space<vmem>>) attributes {dimension_semantics = [#tpu.dimension_semantics<parallel>], iteration_bounds = array<i64: 1>, scalar_prefetch = 0 : i64, scratch_operands = 0 : i64, tpu.core_type = #tpu.core_type<tc>, window_params = [{transform_indices = @transform_0, window_bounds = array<i64: 16, 128>}, {transform_indices = @transform_1, window_bounds = array<i64: 16, 128>}]} {
    %c0 = arith.constant 0 : index
    %c0_0 = arith.constant 0 : index
    %0 = vector.load %arg1[%c0, %c0_0] : memref<16x128xf32, #tpu.memory_space<vmem>>, vector<16x128xf32>
    %1 = tpu.bitcast %0 : vector<16x128xf32> -> vector<16x128xi32>
    %c-524288_i32 = arith.constant -524288 : i32
    %2 = vector.broadcast %c-524288_i32 : i32 to vector<16x128xi32>
    %3 = arith.andi %1, %2 : vector<16x128xi32>
    %4 = tpu.bitcast %3 : vector<16x128xi32> -> vector<16x128xf32>
    %5 = tpu.weird %0 : vector<16x128xf32> -> vector<16x128xi1>
    %cst = arith.constant dense<true> : vector<16x128xi1>
    %6 = arith.xori %5, %cst : vector<16x128xi1>
    %7 = arith.select %6, %4, %0 : vector<16x128xi1>, vector<16x128xf32>
    %c0_1 = arith.constant 0 : index
    %c0_2 = arith.constant 0 : index
    %8 = vector.load %arg2[%c0_1, %c0_2] : memref<16x128xf32, #tpu.memory_space<vmem>>, vector<16x128xf32>
    tpu.vector_store %arg2[%c0_1, %c0_2], %7 {strides = array<i32>} : memref<16x128xf32, #tpu.memory_space<vmem>>, vector<16x128xf32>,
    return
  }
  func.func @transform_0(%arg0: i32) -> (i32, i32) {
    %c0_i32 = arith.constant 0 : i32
    %c0_i32_0 = arith.constant 0 : i32
    return %arg0, %c0_i32 : i32, i32
  }
  func.func @transform_1(%arg0: i32) -> (i32, i32) {
    %c0_i32 = arith.constant 0 : i32
    %c0_i32_0 = arith.constant 0 : i32
    return %arg0, %c0_i32 : i32, i32
  }
}

</mosaic_0001>

<bundles_post_ra>
// kernel: tpu_custom_call.1
= control target key start
LH: loop header
LB: loop body
LE: loop exit
PB: predicated region body
PF: predicated region fallthrough
CT: control target
= control target key end

     0   :  { %6 = vsyncpa [#allocation3], 0  ;;  %s154_s0 = inlined_call_operand.hbm [shape: f32[16,128], index: 0, kind: input, shape index: {}]   ;;  %s155_s1 = inlined_call_operand.hbm [shape: f32[16,128], index: 1, kind: output, shape index: {}]  }
   0x1   :  { %7 = vsyncpa [#allocation4], 0  ;;  %s109_s6 = smov [#allocation2]   ;;  %s61_s10 = scalar_lea.hbm %s154_s0, 256 }
   0x2   :  { %s13_s7 = sshll.u32 %s109_s6, 4  ;;  %p62_p0 = scmp.ne.s32.totalorder %s154_s0, %s61_s10  ;;  %s14_s7 = int_to_ptr.vmem [resolvable:$true] %s13_s7 }
   0x3   :  { %p65_p1 = scmp.lt.u32.totalorder %s61_s10, %s154_s0 }
   0x5   :  { %p67_p2 = pnand %p65_p1, %p62_p0 }
   0x7   :  { %70 = shalt.err (!%p67_p2)
}
   0x8   :  { %s71_s15 = scalar_lea.vmem %s14_s7, 256  ;;  %p76_p4 = scmp.lt.s32.totalorder %s14_s7, %s14_s7 }
   0x9   :  { %p72_p3 = scmp.ne.s32.totalorder %s14_s7, %s71_s15  ;;  %p77_p5 = scmp.lt.s32.totalorder %s71_s15, %s71_s15 }
   0xb   :  { %p78_p6 = por %p77_p5, %p76_p4 }
   0xd   :  { %p79_p7 = pnand %p78_p6, %p72_p3 }
   0xf   :  { %82 = shalt.err (!%p79_p7)
}
  0x10   :  { %s110_s16 = smov 128   ;;  %s111_s17 = smov 8  }
  0x11   :  { %19 = dma.hbm_to_vmem [thread:$0]  %s154_s0, 256, %s14_s7, [#allocation3], %s110_s16, %s110_s16, %s111_s17  }
  0x12   :  { %105 = dma.done.wait [#allocation3], 256  }
  0x13   :  { %106 = vsyncadd [#allocation3], 4294967040  ;;  %v23_v0 = vld [vmem:[#allocation2] sm:$0xff]  ;;  %v24_v1 = vld [vmem:[#allocation2 + $0x8] sm:$0xff]  ;;  %s112_s20 = smov [#allocation5]   ;;  %vm113_vm2 = vmmov 1  }
  0x14   :  { %s44_s21 = sshll.u32 %s112_s20, 4  ;;  %v27_v2 = vand.u32 4294443008, %v23_v0  ;;  %vm31_vm0 = vweird.f32 %v23_v0  ;;  %v28_v3 = vand.u32 4294443008, %v24_v1  ;;  %vm32_vm1 = vweird.f32 %v24_v1  ;;  %s45_s21 = int_to_ptr.vmem [resolvable:$true] %s44_s21 }
  0x15   :  { %vm33_vm3 = vmxor %vm31_vm0, %vm113_vm2  ;;  %s83_s22 = scalar_lea.vmem %s45_s21, 256  ;;  %p88_p9 = scmp.lt.s32.totalorder %s45_s21, %s45_s21 }
  0x16   :  { %v35_v4 = vsel %vm33_vm3, %v27_v2, %v23_v0  ;;  %vm34_vm4 = vmxor %vm32_vm1, %vm113_vm2  ;;  %p84_p8 = scmp.ne.s32.totalorder %s45_s21, %s83_s22  ;;  %p89_p10 = scmp.lt.s32.totalorder %s83_s22, %s83_s22 }
  0x17   :  { %37 = vst [vmem:[#allocation5] sm:$0xff] %v35_v4  ;;  %v36_v5 = vsel %vm34_vm4, %v28_v3, %v24_v1 }
  0x18   :  { %38 = vst [vmem:[#allocation5 + $0x8] sm:$0xff] %v36_v5  ;;  %p90_p11 = por %p89_p10, %p88_p9 }
  0x1a   :  { %p91_p12 = pnand %p90_p11, %p84_p8 }
  0x1c   :  { %94 = shalt.err (!%p91_p12)
}
  0x1d   :  { %s95_s24 = scalar_lea.hbm %s155_s1, 256 }
  0x1e   :  { %p96_p13 = scmp.ne.s32.totalorder %s155_s1, %s95_s24  ;;  %p99_p0 = scmp.lt.u32.totalorder %s95_s24, %s155_s1 }
  0x20   :  { %p101_p1 = pnand %p99_p0, %p96_p13 }
  0x22   :  { %104 = shalt.err (!%p101_p1)
}
  0x23   :  { %50 = dma.vmem_to_hbm [thread:$0]  %s45_s21, 256, %s155_s1, [#allocation4], %s110_s16, %s110_s16, %s111_s17  }
  0x24   :  { %107 = dma.done.wait [#allocation4], 256  }
  0x25   :  { %108 = vsyncadd [#allocation4], 4294967040 }
  0x26   :  { %54 = vsyncpa [#allocation3], 1 }
  0x27   :  { %55 = vsyncpa [#allocation4], 1 }

</bundles_post_ra>
